<compile_context>
chip_gen: v5e
topology: v5e:2x2
jax: 0.10.0
libtpu: 0.0.40
codegen_flags: <defaults>
</compile_context>

<pallas_src>
import math
import functools

import jax
import jax.numpy as jnp
from jax.experimental import pallas as pl
from jax.experimental.pallas import tpu as pltpu


def _attn_kernel(x_ref, wq_ref, bq_ref, wk_ref, bk_ref, wv_ref, bv_ref,
                 wo_ref, bo_ref, *refs, num_heads, head_dim, q_tile, vis):
    if vis:
        out_ref, probs_ref, kt_sc, v_sc, ctx_sc = refs
    else:
        out_ref, kt_sc, v_sc, ctx_sc = refs
        probs_ref = None

    qi = pl.program_id(1)

    # --- K/V projections: once per batch element (qi == 0), cached in bf16 VMEM.
    # K is cached pre-transposed (H, S): one XLU transpose amortized over all
    # query tiles; per-head scores become a standard [M,K]x[K,N] MXU feed. -----
    @pl.when(qi == 0)
    def _():
        x_kv = x_ref[0]                                                  # (S, H) bf16
        k = jnp.dot(x_kv, wk_ref[...],
                    preferred_element_type=jnp.float32) + bk_ref[...]    # (S, H) f32
        v = jnp.dot(x_kv, wv_ref[...],
                    preferred_element_type=jnp.float32) + bv_ref[...]
        kt_sc[...] = jnp.transpose(k).astype(jnp.bfloat16)               # (H, S)
        v_sc[...] = v.astype(jnp.bfloat16)                               # (S, H)

    # --- Q projection for this query tile (sliced from the full-seq block; no
    # duplicated x input). 1/sqrt(head_dim) is folded into wq/bq in the wrapper.
    q_start = pl.multiple_of(qi * q_tile, q_tile)
    x_q = x_ref[0, pl.ds(q_start, q_tile), :]                            # (TQ, H) bf16
    q = (jnp.dot(x_q, wq_ref[...], preferred_element_type=jnp.float32)
         + bq_ref[...]).astype(jnp.bfloat16)                             # (TQ, H)

    # TODO(synk): for num_heads >= 8, convert this static loop to lax.fori_loop
    # with pl.ds slices to bound vreg live ranges / compile time.
    for h in range(num_heads):                                           # static loop
        lo = h * head_dim
        qh = q[:, lo:lo + head_dim]                                      # (TQ, hd)
        kh_t = kt_sc[lo:lo + head_dim, :]                                # (hd, S)
        vh = v_sc[:, lo:lo + head_dim]                                   # (S, hd)

        scores = jnp.dot(qh, kh_t,
                         preferred_element_type=jnp.float32)             # (TQ, S)

        m = jnp.max(scores, axis=-1, keepdims=True)
        # bf16 exp: EUP runs bf16 ~2x f32 on v6e/v7x; sums / normalization in f32.
        e = jnp.exp((scores - m).astype(jnp.bfloat16)).astype(jnp.float32)
        denom = jnp.sum(e, axis=-1, keepdims=True)
        # Approx (EUP) reciprocal: returned prob rows sum to ~1, not exactly 1.
        probs = e * pl.reciprocal(denom, approx=True)                    # softmax(dim=-1)

        if vis:
            probs_ref[0, h] = probs.astype(probs_ref.dtype)
        # attn_dropout is identity at inference.

        # Concat(head contexts) built in VMEM; output projection done once below.
        ctx_sc[:, lo:lo + head_dim] = jnp.dot(
            probs.astype(jnp.bfloat16), vh,
            preferred_element_type=jnp.float32).astype(jnp.bfloat16)

    # Single full-width (K = H) output projection: uses the full MXU contraction
    # depth instead of num_heads matmuls contracting only head_dim.
    out = jnp.dot(ctx_sc[...], wo_ref[...],
                  preferred_element_type=jnp.float32) + bo_ref[...]
    # proj_dropout is identity at inference.
    out_ref[0] = out.astype(out_ref.dtype)


def _vmem_limit_bytes(S, H, q_tile, num_heads, vis):
    """Explicit scoped-VMEM budget derived from the actual kernel footprint."""
    bf16, f32 = 2, 4
    weights = 4 * H * H * bf16                        # Buffered(1) weight blocks
    biases = 4 * H * f32
    x_blk = 2 * S * H * bf16                          # double-buffered full-seq x
    out_blk = 2 * q_tile * H * f32                    # double-buffered output tile
    probs_blk = (2 * num_heads * q_tile * S * bf16) if vis else 0
    scratch = (H * S + S * H + q_tile * H) * bf16     # K^T, V, ctx caches
    total = weights + biases + x_blk + out_blk + probs_blk + scratch
    # 1.5x + 8 MiB headroom for compiler-internal scratch; never below the
    # default scoped limit; cap below physical VMEM.
    return int(min(max(1.5 * total + (8 << 20), 32 << 20), 120 << 20))


def normal_attention(x, params, num_heads, *, vis=True, q_tile=None,
                     probs_dtype=jnp.bfloat16):
    """x: (B, S, H) float32. Returns (attention_output, weights-or-None)."""
    B, S, H = x.shape
    assert H % num_heads == 0
    head_dim = H // num_heads

    if q_tile is None:
        # TODO(synk): on v7x (64 MiB VMEM) keep q_tile <= 128 with vis=True; on
        # v5e/v6e (128 MiB) larger tiles (256) amortize per-step overhead.
        q_tile = min(128, S)
    # TODO(synk): real ViT shapes (e.g. S=197) must be padded externally and a
    # key-padding mask added to the scores before softmax.
    assert S % q_tile == 0
    n_q_tiles = S // q_tile

    kernel = functools.partial(_attn_kernel, num_heads=num_heads,
                               head_dim=head_dim, q_tile=q_tile, vis=vis)

    inv_scale = 1.0 / math.sqrt(head_dim)
    # bf16 activations/weights for the MXU (kernel accumulates in f32); biases
    # stay f32. Fold 1/sqrt(head_dim) into the query projection. (Call under
    # jax.jit so these casts fuse and are not re-materialized per invocation.)
    x_bf = x.astype(jnp.bfloat16)
    wq = (params["wq"] * inv_scale).astype(jnp.bfloat16)
    bq = params["bq"] * inv_scale
    wk = params["wk"].astype(jnp.bfloat16)
    wv = params["wv"].astype(jnp.bfloat16)
    wo = params["wo"].astype(jnp.bfloat16)
    bk, bv, bo = params["bk"], params["bv"], params["bo"]

    # Grid-invariant weight/bias blocks: single-buffered (block index never
    # changes, so a second pipeline buffer would be pure VMEM waste).
    w_spec = pl.BlockSpec((H, H), lambda b, qi: (0, 0),
                          pipeline_mode=pl.Buffered(1))
    b_spec = pl.BlockSpec((1, H), lambda b, qi: (0, 0),
                          pipeline_mode=pl.Buffered(1))

    in_specs = [
        pl.BlockSpec((1, S, H), lambda b, qi: (b, 0, 0)),   # x (full sequence)
        w_spec, b_spec,                                     # query proj (pre-scaled)
        w_spec, b_spec,                                     # key proj
        w_spec, b_spec,                                     # value proj
        w_spec, b_spec,                                     # out proj
    ]

    out_shape = [jax.ShapeDtypeStruct((B, S, H), x.dtype)]
    out_specs = [pl.BlockSpec((1, q_tile, H), lambda b, qi: (b, qi, 0))]
    if vis:
        out_shape.append(jax.ShapeDtypeStruct((B, num_heads, S, S), probs_dtype))
        out_specs.append(
            pl.BlockSpec((1, num_heads, q_tile, S), lambda b, qi: (b, 0, qi, 0)))

    results = pl.pallas_call(
        kernel,
        out_shape=tuple(out_shape),
        grid=(B, n_q_tiles),
        in_specs=in_specs,
        out_specs=tuple(out_specs),
        scratch_shapes=[
            pltpu.VMEM((H, S), jnp.bfloat16),        # cached K^T (per batch element)
            pltpu.VMEM((S, H), jnp.bfloat16),        # cached V  (per batch element)
            pltpu.VMEM((q_tile, H), jnp.bfloat16),   # concat(head contexts) buffer
        ],
        compiler_params=pltpu.CompilerParams(
            # Batch axis parallel (megacore-shardable); query-tile axis arbitrary
            # because K/V are computed at qi == 0 and carried across tiles.
            # TODO(synk): on v7x with B == 1, add a head/tile-level parallel split
            # (or VMEM_SHARED K/V) so the second TensorCore is not idle.
            dimension_semantics=("parallel", "arbitrary"),
            vmem_limit_bytes=_vmem_limit_bytes(S, H, q_tile, num_heads, vis)),
    )(x_bf, wq, bq, wk, bk, wv, bv, wo, bo)

    if vis:
        out, weights = results
        return out, weights
    (out,) = results
    return out, None


def make_params(key, hidden):
    """Deterministic synthetic parameters; stored pre-transposed as [in, out], f32."""
    keys = jax.random.split(key, 8)
    scale = 0.02

    def linear(kw, kb):
        w = scale * jax.random.normal(kw, (hidden, hidden), jnp.float32)  # [out, in]
        b = scale * jax.random.normal(kb, (hidden,), jnp.float32)
        return w.T, b.reshape(1, hidden)

    wq, bq = linear(keys[0], keys[1])
    wk, bk = linear(keys[2], keys[3])
    wv, bv = linear(keys[4], keys[5])
    wo, bo = linear(keys[6], keys[7])
    return dict(wq=wq, bq=bq, wk=wk, bk=bk, wv=wv, bv=bv, wo=wo, bo=bo)


def _reference(x, params, num_heads):
    """Plain-JAX f32 reference mirroring the PyTorch forward (eval mode)."""
    B, S, H = x.shape
    hd = H // num_heads
    q = x @ params["wq"] + params["bq"]
    k = x @ params["wk"] + params["bk"]
    v = x @ params["wv"] + params["bv"]

    def split(t):
        return t.reshape(B, S, num_heads, hd).transpose(0, 2, 1, 3)

    qh, kh, vh = split(q), split(k), split(v)
    scores = jnp.einsum("bhqd,bhkd->bhqk", qh, kh) / math.sqrt(hd)
    probs = jax.nn.softmax(scores, axis=-1)
    ctx = jnp.einsum("bhqk,bhkd->bhqd", probs, vh)
    ctx = ctx.transpose(0, 2, 1, 3).reshape(B, S, H)
    out = ctx @ params["wo"] + params["bo"]
    return out, probs


if __name__ == "__main__":
    # Small ViT-like config: hidden=64, num_heads=4 (head_dim=16), seq=16, batch=2.
    # q_tile=8 -> 2 query tiles per batch element (exercises the K/V cache carry).
    B, S, H, NH = 2, 16, 64, 4

    key = jax.random.PRNGKey(0)
    kx, kp = jax.random.split(key)
    x = jax.random.normal(kx, (B, S, H), jnp.float32)
    params = make_params(kp, H)

    # jit so the bf16 casts / query-scale fold are compiled once with the kernel.
    attn_vis = jax.jit(functools.partial(normal_attention, num_heads=NH,
                                         vis=True, q_tile=8))
    attn_novis = jax.jit(functools.partial(normal_attention, num_heads=NH,
                                           vis=False, q_tile=8))

    # vis=True path (returns attention weights, like the PyTorch module with vis).
    out, weights = attn_vis(x, params)
    out = jax.block_until_ready(out)
    weights = jax.block_until_ready(weights)

    ref_out, ref_w = _reference(x, params, NH)
    assert out.shape == (B, S, H) and weights.shape == (B, NH, S, S)
    # Kernel matmuls/exp run in bf16 (f32 accumulation), probs stored in bf16 and
    # normalized with the EUP approx reciprocal -> compare with loose tolerances.
    assert jnp.allclose(out, ref_out, atol=1e-2, rtol=5e-2), \
        float(jnp.max(jnp.abs(out - ref_out)))
    w32 = weights.astype(jnp.float32)
    assert jnp.allclose(w32, ref_w, atol=1e-2, rtol=5e-2), \
        float(jnp.max(jnp.abs(w32 - ref_w)))

    # vis=False path: no (B, nh, S, S) HBM writeback from the hot kernel at all.
    out2, w2 = attn_novis(x, params)
    out2 = jax.block_until_ready(out2)
    assert w2 is None
    assert jnp.allclose(out2, ref_out, atol=1e-2, rtol=5e-2)

    print("KERNEL_OK")
</pallas_src>

<mosaic_0001>
module attributes {stable_mosaic.version = 11 : i64} {
  func.func @_attn_kernel(%arg0: i32, %arg1: i32, %arg2: memref<1x16x64xbf16, #tpu.memory_space<vmem>>, %arg3: memref<64x64xbf16, #tpu.memory_space<vmem>>, %arg4: memref<1x64xf32, #tpu.memory_space<vmem>>, %arg5: memref<64x64xbf16, #tpu.memory_space<vmem>>, %arg6: memref<1x64xf32, #tpu.memory_space<vmem>>, %arg7: memref<64x64xbf16, #tpu.memory_space<vmem>>, %arg8: memref<1x64xf32, #tpu.memory_space<vmem>>, %arg9: memref<64x64xbf16, #tpu.memory_space<vmem>>, %arg10: memref<1x64xf32, #tpu.memory_space<vmem>>, %arg11: memref<1x8x64xf32, #tpu.memory_space<vmem>>, %arg12: memref<1x4x8x16xbf16, #tpu.memory_space<vmem>>, %arg13: memref<64x16xbf16, #tpu.memory_space<vmem>>, %arg14: memref<16x64xbf16, #tpu.memory_space<vmem>>, %arg15: memref<8x64xbf16, #tpu.memory_space<vmem>>) attributes {dimension_semantics = [#tpu.dimension_semantics<parallel>, #tpu.dimension_semantics<arbitrary>], iteration_bounds = array<i64: 2, 2>, scalar_prefetch = 0 : i64, scratch_operands = 3 : i64, tpu.core_type = #tpu.core_type<tc>, window_params = [{transform_indices = @transform_0, window_bounds = array<i64: 1, 16, 64>}, {pipeline_mode = #tpu.pipeline_mode<synchronous>, transform_indices = @transform_1, window_bounds = array<i64: 64, 64>}, {pipeline_mode = #tpu.pipeline_mode<synchronous>, transform_indices = @transform_2, window_bounds = array<i64: 1, 64>}, {pipeline_mode = #tpu.pipeline_mode<synchronous>, transform_indices = @transform_3, window_bounds = array<i64: 64, 64>}, {pipeline_mode = #tpu.pipeline_mode<synchronous>, transform_indices = @transform_4, window_bounds = array<i64: 1, 64>}, {pipeline_mode = #tpu.pipeline_mode<synchronous>, transform_indices = @transform_5, window_bounds = array<i64: 64, 64>}, {pipeline_mode = #tpu.pipeline_mode<synchronous>, transform_indices = @transform_6, window_bounds = array<i64: 1, 64>}, {pipeline_mode = #tpu.pipeline_mode<synchronous>, transform_indices = @transform_7, window_bounds = array<i64: 64, 64>}, {pipeline_mode = #tpu.pipeline_mode<synchronous>, transform_indices = @transform_8, window_bounds = array<i64: 1, 64>}, {transform_indices = @transform_9, window_bounds = array<i64: 1, 8, 64>}, {transform_indices = @transform_10, window_bounds = array<i64: 1, 4, 8, 16>}]} {
    %c0_i32 = arith.constant 0 : i32
    %0 = arith.cmpi eq, %arg1, %c0_i32 : i32
    %1 = arith.extui %0 : i1 to i32
    %c0_i32_0 = arith.constant 0 : i32
    %2 = arith.cmpi ne, %1, %c0_i32_0 : i32
    scf.if %2 {
      %c0_66 = arith.constant 0 : index
      %c0_67 = arith.constant 0 : index
      %c0_68 = arith.constant 0 : index
      %119 = vector.load %arg2[%c0_66, %c0_67, %c0_68] : memref<1x16x64xbf16, #tpu.memory_space<vmem>>, vector<1x16x64xbf16>
      %120 = vector.shape_cast %119 : vector<1x16x64xbf16> to vector<16x64xbf16>
      %c0_69 = arith.constant 0 : index
      %c0_70 = arith.constant 0 : index
      %121 = vector.load %arg5[%c0_69, %c0_70] : memref<64x64xbf16, #tpu.memory_space<vmem>>, vector<64x64xbf16>
      %cst_71 = arith.constant dense<0.000000e+00> : vector<16x64xf32>
      %122 = tpu.matmul %120, %121, %cst_71 {dimension_numbers = #tpu.dot_dimension_numbers<[1], [0], [0], [1], [0, 0, 1, 1], [], []>} : vector<16x64xbf16>, vector<64x64xbf16>, vector<16x64xf32> -> vector<16x64xf32>
      %c0_72 = arith.constant 0 : index
      %c0_73 = arith.constant 0 : index
      %123 = vector.load %arg6[%c0_72, %c0_73] : memref<1x64xf32, #tpu.memory_space<vmem>>, vector<1x64xf32>
      %124 = vector.broadcast %123 : vector<1x64xf32> to vector<16x64xf32>
      %125 = arith.addf %122, %124 : vector<16x64xf32>
      %c0_74 = arith.constant 0 : index
      %c0_75 = arith.constant 0 : index
      %126 = vector.load %arg7[%c0_74, %c0_75] : memref<64x64xbf16, #tpu.memory_space<vmem>>, vector<64x64xbf16>
      %cst_76 = arith.constant dense<0.000000e+00> : vector<16x64xf32>
      %127 = tpu.matmul %120, %126, %cst_76 {dimension_numbers = #tpu.dot_dimension_numbers<[1], [0], [0], [1], [0, 0, 1, 1], [], []>} : vector<16x64xbf16>, vector<64x64xbf16>, vector<16x64xf32> -> vector<16x64xf32>
      %c0_77 = arith.constant 0 : index
      %c0_78 = arith.constant 0 : index
      %128 = vector.load %arg8[%c0_77, %c0_78] : memref<1x64xf32, #tpu.memory_space<vmem>>, vector<1x64xf32>
      %129 = vector.broadcast %128 : vector<1x64xf32> to vector<16x64xf32>
      %130 = arith.addf %127, %129 : vector<16x64xf32>
      %131 = tpu.transpose %125, [1, 0] : vector<16x64xf32> -> vector<64x16xf32>
      %132 = arith.truncf %131 : vector<64x16xf32> to vector<64x16xbf16>
      %c0_79 = arith.constant 0 : index
      %c0_80 = arith.constant 0 : index
      %133 = vector.load %arg13[%c0_79, %c0_80] : memref<64x16xbf16, #tpu.memory_space<vmem>>, vector<64x16xbf16>
      tpu.vector_store %arg13[%c0_79, %c0_80], %132 {strides = array<i32>} : memref<64x16xbf16, #tpu.memory_space<vmem>>, vector<64x16xbf16>,
      %134 = arith.truncf %130 : vector<16x64xf32> to vector<16x64xbf16>
      %c0_81 = arith.constant 0 : index
      %c0_82 = arith.constant 0 : index
      %135 = vector.load %arg14[%c0_81, %c0_82] : memref<16x64xbf16, #tpu.memory_space<vmem>>, vector<16x64xbf16>
      tpu.vector_store %arg14[%c0_81, %c0_82], %134 {strides = array<i32>} : memref<16x64xbf16, #tpu.memory_space<vmem>>, vector<16x64xbf16>,
    } else {
    }
    %c8_i32 = arith.constant 8 : i32
    %3 = arith.muli %arg1, %c8_i32 : i32
    %4 = tpu.assume_multiple %3, 8 : i32
    %c0 = arith.constant 0 : index
    %5 = arith.index_cast %4 : i32 to index
    %c0_1 = arith.constant 0 : index
    %6 = vector.load %arg2[%c0, %5, %c0_1] : memref<1x16x64xbf16, #tpu.memory_space<vmem>>, vector<1x8x64xbf16>
    %7 = vector.shape_cast %6 : vector<1x8x64xbf16> to vector<8x64xbf16>
    %c0_2 = arith.constant 0 : index
    %c0_3 = arith.constant 0 : index
    %8 = vector.load %arg3[%c0_2, %c0_3] : memref<64x64xbf16, #tpu.memory_space<vmem>>, vector<64x64xbf16>
    %cst = arith.constant dense<0.000000e+00> : vector<8x64xf32>
    %9 = tpu.matmul %7, %8, %cst {dimension_numbers = #tpu.dot_dimension_numbers<[1], [0], [0], [1], [0, 0, 1, 1], [], []>} : vector<8x64xbf16>, vector<64x64xbf16>, vector<8x64xf32> -> vector<8x64xf32>
    %c0_4 = arith.constant 0 : index
    %c0_5 = arith.constant 0 : index
    %10 = vector.load %arg4[%c0_4, %c0_5] : memref<1x64xf32, #tpu.memory_space<vmem>>, vector<1x64xf32>
    %11 = vector.broadcast %10 : vector<1x64xf32> to vector<8x64xf32>
    %12 = arith.addf %9, %11 : vector<8x64xf32>
    %13 = arith.truncf %12 : vector<8x64xf32> to vector<8x64xbf16>
    %14 = vector.extract_strided_slice %13 {offsets = [0, 0], sizes = [8, 16], strides = [1, 1]} : vector<8x64xbf16> to vector<8x16xbf16>
    %c0_6 = arith.constant 0 : index
    %c0_7 = arith.constant 0 : index
    %15 = vector.load %arg13[%c0_6, %c0_7] : memref<64x16xbf16, #tpu.memory_space<vmem>>, vector<16x16xbf16>
    %c0_8 = arith.constant 0 : index
    %c0_9 = arith.constant 0 : index
    %16 = vector.load %arg14[%c0_8, %c0_9] : memref<16x64xbf16, #tpu.memory_space<vmem>>, vector<16x16xbf16>
    %cst_10 = arith.constant dense<0.000000e+00> : vector<8x16xf32>
    %17 = tpu.matmul %14, %15, %cst_10 {dimension_numbers = #tpu.dot_dimension_numbers<[1], [0], [0], [1], [0, 0, 1, 1], [], []>} : vector<8x16xbf16>, vector<16x16xbf16>, vector<8x16xf32> -> vector<8x16xf32>
    %cst_11 = arith.constant dense<0xFF800000> : vector<8xf32>
    %18 = vector.multi_reduction <maximumf>, %17, %cst_11 [1] : vector<8x16xf32> to vector<8xf32>
    %19 = vector.shape_cast %18 : vector<8xf32> to vector<8x1xf32>
    %20 = vector.broadcast %19 : vector<8x1xf32> to vector<8x16xf32>
    %21 = arith.subf %17, %20 : vector<8x16xf32>
    %22 = arith.truncf %21 : vector<8x16xf32> to vector<8x16xbf16>
    %23 = math.exp %22 : vector<8x16xbf16>
    %24 = arith.extf %23 : vector<8x16xbf16> to vector<8x16xf32>
    %cst_12 = arith.constant dense<0.000000e+00> : vector<8xf32>
    %25 = vector.multi_reduction <add>, %24, %cst_12 [1] : vector<8x16xf32> to vector<8xf32>
    %26 = vector.shape_cast %25 : vector<8xf32> to vector<8x1xf32>
    %27 = tpu.reciprocal %26 {approx = true} : vector<8x1xf32> -> vector<8x1xf32>
    %28 = vector.broadcast %27 : vector<8x1xf32> to vector<8x16xf32>
    %29 = arith.mulf %24, %28 : vector<8x16xf32>
    %30 = arith.truncf %29 : vector<8x16xf32> to vector<8x16xbf16>
    %c0_13 = arith.constant 0 : index
    %c0_14 = arith.constant 0 : index
    %c0_15 = arith.constant 0 : index
    %c0_16 = arith.constant 0 : index
    %31 = vector.load %arg12[%c0_13, %c0_14, %c0_15, %c0_16] : memref<1x4x8x16xbf16, #tpu.memory_space<vmem>>, vector<1x1x8x16xbf16>
    %32 = vector.shape_cast %31 : vector<1x1x8x16xbf16> to vector<8x16xbf16>
    %33 = vector.shape_cast %30 : vector<8x16xbf16> to vector<1x1x8x16xbf16>
    tpu.vector_store %arg12[%c0_13, %c0_14, %c0_15, %c0_16], %33 {strides = array<i32>} : memref<1x4x8x16xbf16, #tpu.memory_space<vmem>>, vector<1x1x8x16xbf16>,
    %34 = arith.truncf %29 : vector<8x16xf32> to vector<8x16xbf16>
    %cst_17 = arith.constant dense<0.000000e+00> : vector<8x16xf32>
    %35 = tpu.matmul %34, %16, %cst_17 {dimension_numbers = #tpu.dot_dimension_numbers<[1], [0], [0], [1], [0, 0, 1, 1], [], []>} : vector<8x16xbf16>, vector<16x16xbf16>, vector<8x16xf32> -> vector<8x16xf32>
    %36 = arith.truncf %35 : vector<8x16xf32> to vector<8x16xbf16>
    %c0_18 = arith.constant 0 : index
    %c0_19 = arith.constant 0 : index
    %37 = vector.load %arg15[%c0_18, %c0_19] : memref<8x64xbf16, #tpu.memory_space<vmem>>, vector<8x16xbf16>
    tpu.vector_store %arg15[%c0_18, %c0_19], %36 {strides = array<i32>} : memref<8x64xbf16, #tpu.memory_space<vmem>>, vector<8x16xbf16>,
    %38 = vector.extract_strided_slice %13 {offsets = [0, 16], sizes = [8, 16], strides = [1, 1]} : vector<8x64xbf16> to vector<8x16xbf16>
    %c16 = arith.constant 16 : index
    %c0_20 = arith.constant 0 : index
    %39 = vector.load %arg13[%c16, %c0_20] : memref<64x16xbf16, #tpu.memory_space<vmem>>, vector<16x16xbf16>
    %c0_21 = arith.constant 0 : index
    %c16_22 = arith.constant 16 : index
    %40 = vector.load %arg14[%c0_21, %c16_22] : memref<16x64xbf16, #tpu.memory_space<vmem>>, vector<16x16xbf16>
    %cst_23 = arith.constant dense<0.000000e+00> : vector<8x16xf32>
    %41 = tpu.matmul %38, %39, %cst_23 {dimension_numbers = #tpu.dot_dimension_numbers<[1], [0], [0], [1], [0, 0, 1, 1], [], []>} : vector<8x16xbf16>, vector<16x16xbf16>, vector<8x16xf32> -> vector<8x16xf32>
    %cst_24 = arith.constant dense<0xFF800000> : vector<8xf32>
    %42 = vector.multi_reduction <maximumf>, %41, %cst_24 [1] : vector<8x16xf32> to vector<8xf32>
    %43 = vector.shape_cast %42 : vector<8xf32> to vector<8x1xf32>
    %44 = vector.broadcast %43 : vector<8x1xf32> to vector<8x16xf32>
    %45 = arith.subf %41, %44 : vector<8x16xf32>
    %46 = arith.truncf %45 : vector<8x16xf32> to vector<8x16xbf16>
    %47 = math.exp %46 : vector<8x16xbf16>
    %48 = arith.extf %47 : vector<8x16xbf16> to vector<8x16xf32>
    %cst_25 = arith.constant dense<0.000000e+00> : vector<8xf32>
    %49 = vector.multi_reduction <add>, %48, %cst_25 [1] : vector<8x16xf32> to vector<8xf32>
    %50 = vector.shape_cast %49 : vector<8xf32> to vector<8x1xf32>
    %51 = tpu.reciprocal %50 {approx = true} : vector<8x1xf32> -> vector<8x1xf32>
    %52 = vector.broadcast %51 : vector<8x1xf32> to vector<8x16xf32>
    %53 = arith.mulf %48, %52 : vector<8x16xf32>
    %54 = arith.truncf %53 : vector<8x16xf32> to vector<8x16xbf16>
    %c0_26 = arith.constant 0 : index
    %c1 = arith.constant 1 : index
    %c0_27 = arith.constant 0 : index
    %c0_28 = arith.constant 0 : index
    %55 = vector.load %arg12[%c0_26, %c1, %c0_27, %c0_28] : memref<1x4x8x16xbf16, #tpu.memory_space<vmem>>, vector<1x1x8x16xbf16>
    %56 = vector.shape_cast %55 : vector<1x1x8x16xbf16> to vector<8x16xbf16>
    %57 = vector.shape_cast %54 : vector<8x16xbf16> to vector<1x1x8x16xbf16>
    tpu.vector_store %arg12[%c0_26, %c1, %c0_27, %c0_28], %57 {strides = array<i32>} : memref<1x4x8x16xbf16, #tpu.memory_space<vmem>>, vector<1x1x8x16xbf16>,
    %58 = arith.truncf %53 : vector<8x16xf32> to vector<8x16xbf16>
    %cst_29 = arith.constant dense<0.000000e+00> : vector<8x16xf32>
    %59 = tpu.matmul %58, %40, %cst_29 {dimension_numbers = #tpu.dot_dimension_numbers<[1], [0], [0], [1], [0, 0, 1, 1], [], []>} : vector<8x16xbf16>, vector<16x16xbf16>, vector<8x16xf32> -> vector<8x16xf32>
    %60 = arith.truncf %59 : vector<8x16xf32> to vector<8x16xbf16>
    %c0_30 = arith.constant 0 : index
    %c16_31 = arith.constant 16 : index
    %61 = vector.load %arg15[%c0_30, %c16_31] : memref<8x64xbf16, #tpu.memory_space<vmem>>, vector<8x16xbf16>
    tpu.vector_store %arg15[%c0_30, %c16_31], %60 {strides = array<i32>} : memref<8x64xbf16, #tpu.memory_space<vmem>>, vector<8x16xbf16>,
    %62 = vector.extract_strided_slice %13 {offsets = [0, 32], sizes = [8, 16], strides = [1, 1]} : vector<8x64xbf16> to vector<8x16xbf16>
    %c32 = arith.constant 32 : index
    %c0_32 = arith.constant 0 : index
    %63 = vector.load %arg13[%c32, %c0_32] : memref<64x16xbf16, #tpu.memory_space<vmem>>, vector<16x16xbf16>
    %c0_33 = arith.constant 0 : index
    %c32_34 = arith.constant 32 : index
    %64 = vector.load %arg14[%c0_33, %c32_34] : memref<16x64xbf16, #tpu.memory_space<vmem>>, vector<16x16xbf16>
    %cst_35 = arith.constant dense<0.000000e+00> : vector<8x16xf32>
    %65 = tpu.matmul %62, %63, %cst_35 {dimension_numbers = #tpu.dot_dimension_numbers<[1], [0], [0], [1], [0, 0, 1, 1], [], []>} : vector<8x16xbf16>, vector<16x16xbf16>, vector<8x16xf32> -> vector<8x16xf32>
    %cst_36 = arith.constant dense<0xFF800000> : vector<8xf32>
    %66 = vector.multi_reduction <maximumf>, %65, %cst_36 [1] : vector<8x16xf32> to vector<8xf32>
    %67 = vector.shape_cast %66 : vector<8xf32> to vector<8x1xf32>
    %68 = vector.broadcast %67 : vector<8x1xf32> to vector<8x16xf32>
    %69 = arith.subf %65, %68 : vector<8x16xf32>
    %70 = arith.truncf %69 : vector<8x16xf32> to vector<8x16xbf16>
    %71 = math.exp %70 : vector<8x16xbf16>
    %72 = arith.extf %71 : vector<8x16xbf16> to vector<8x16xf32>
    %cst_37 = arith.constant dense<0.000000e+00> : vector<8xf32>
    %73 = vector.multi_reduction <add>, %72, %cst_37 [1] : vector<8x16xf32> to vector<8xf32>
    %74 = vector.shape_cast %73 : vector<8xf32> to vector<8x1xf32>
    %75 = tpu.reciprocal %74 {approx = true} : vector<8x1xf32> -> vector<8x1xf32>
    %76 = vector.broadcast %75 : vector<8x1xf32> to vector<8x16xf32>
    %77 = arith.mulf %72, %76 : vector<8x16xf32>
    %78 = arith.truncf %77 : vector<8x16xf32> to vector<8x16xbf16>
    %c0_38 = arith.constant 0 : index
    %c2 = arith.constant 2 : index
    %c0_39 = arith.constant 0 : index
    %c0_40 = arith.constant 0 : index
    %79 = vector.load %arg12[%c0_38, %c2, %c0_39, %c0_40] : memref<1x4x8x16xbf16, #tpu.memory_space<vmem>>, vector<1x1x8x16xbf16>
    %80 = vector.shape_cast %79 : vector<1x1x8x16xbf16> to vector<8x16xbf16>
    %81 = vector.shape_cast %78 : vector<8x16xbf16> to vector<1x1x8x16xbf16>
    tpu.vector_store %arg12[%c0_38, %c2, %c0_39, %c0_40], %81 {strides = array<i32>} : memref<1x4x8x16xbf16, #tpu.memory_space<vmem>>, vector<1x1x8x16xbf16>,
    %82 = arith.truncf %77 : vector<8x16xf32> to vector<8x16xbf16>
    %cst_41 = arith.constant dense<0.000000e+00> : vector<8x16xf32>
    %83 = tpu.matmul %82, %64, %cst_41 {dimension_numbers = #tpu.dot_dimension_numbers<[1], [0], [0], [1], [0, 0, 1, 1], [], []>} : vector<8x16xbf16>, vector<16x16xbf16>, vector<8x16xf32> -> vector<8x16xf32>
    %84 = arith.truncf %83 : vector<8x16xf32> to vector<8x16xbf16>
    %c0_42 = arith.constant 0 : index
    %c32_43 = arith.constant 32 : index
    %85 = vector.load %arg15[%c0_42, %c32_43] : memref<8x64xbf16, #tpu.memory_space<vmem>>, vector<8x16xbf16>
    tpu.vector_store %arg15[%c0_42, %c32_43], %84 {strides = array<i32>} : memref<8x64xbf16, #tpu.memory_space<vmem>>, vector<8x16xbf16>,
    %86 = vector.extract_strided_slice %13 {offsets = [0, 48], sizes = [8, 16], strides = [1, 1]} : vector<8x64xbf16> to vector<8x16xbf16>
    %c48 = arith.constant 48 : index
    %c0_44 = arith.constant 0 : index
    %87 = vector.load %arg13[%c48, %c0_44] : memref<64x16xbf16, #tpu.memory_space<vmem>>, vector<16x16xbf16>
    %c0_45 = arith.constant 0 : index
    %c48_46 = arith.constant 48 : index
    %88 = vector.load %arg14[%c0_45, %c48_46] : memref<16x64xbf16, #tpu.memory_space<vmem>>, vector<16x16xbf16>
    %cst_47 = arith.constant dense<0.000000e+00> : vector<8x16xf32>
    %89 = tpu.matmul %86, %87, %cst_47 {dimension_numbers = #tpu.dot_dimension_numbers<[1], [0], [0], [1], [0, 0, 1, 1], [], []>} : vector<8x16xbf16>, vector<16x16xbf16>, vector<8x16xf32> -> vector<8x16xf32>
    %cst_48 = arith.constant dense<0xFF800000> : vector<8xf32>
    %90 = vector.multi_reduction <maximumf>, %89, %cst_48 [1] : vector<8x16xf32> to vector<8xf32>
    %91 = vector.shape_cast %90 : vector<8xf32> to vector<8x1xf32>
    %92 = vector.broadcast %91 : vector<8x1xf32> to vector<8x16xf32>
    %93 = arith.subf %89, %92 : vector<8x16xf32>
    %94 = arith.truncf %93 : vector<8x16xf32> to vector<8x16xbf16>
    %95 = math.exp %94 : vector<8x16xbf16>
    %96 = arith.extf %95 : vector<8x16xbf16> to vector<8x16xf32>
    %cst_49 = arith.constant dense<0.000000e+00> : vector<8xf32>
    %97 = vector.multi_reduction <add>, %96, %cst_49 [1] : vector<8x16xf32> to vector<8xf32>
    %98 = vector.shape_cast %97 : vector<8xf32> to vector<8x1xf32>
    %99 = tpu.reciprocal %98 {approx = true} : vector<8x1xf32> -> vector<8x1xf32>
    %100 = vector.broadcast %99 : vector<8x1xf32> to vector<8x16xf32>
    %101 = arith.mulf %96, %100 : vector<8x16xf32>
    %102 = arith.truncf %101 : vector<8x16xf32> to vector<8x16xbf16>
    %c0_50 = arith.constant 0 : index
    %c3 = arith.constant 3 : index
    %c0_51 = arith.constant 0 : index
    %c0_52 = arith.constant 0 : index
    %103 = vector.load %arg12[%c0_50, %c3, %c0_51, %c0_52] : memref<1x4x8x16xbf16, #tpu.memory_space<vmem>>, vector<1x1x8x16xbf16>
    %104 = vector.shape_cast %103 : vector<1x1x8x16xbf16> to vector<8x16xbf16>
    %105 = vector.shape_cast %102 : vector<8x16xbf16> to vector<1x1x8x16xbf16>
    tpu.vector_store %arg12[%c0_50, %c3, %c0_51, %c0_52], %105 {strides = array<i32>} : memref<1x4x8x16xbf16, #tpu.memory_space<vmem>>, vector<1x1x8x16xbf16>,
    %106 = arith.truncf %101 : vector<8x16xf32> to vector<8x16xbf16>
    %cst_53 = arith.constant dense<0.000000e+00> : vector<8x16xf32>
    %107 = tpu.matmul %106, %88, %cst_53 {dimension_numbers = #tpu.dot_dimension_numbers<[1], [0], [0], [1], [0, 0, 1, 1], [], []>} : vector<8x16xbf16>, vector<16x16xbf16>, vector<8x16xf32> -> vector<8x16xf32>
    %108 = arith.truncf %107 : vector<8x16xf32> to vector<8x16xbf16>
    %c0_54 = arith.constant 0 : index
    %c48_55 = arith.constant 48 : index
    %109 = vector.load %arg15[%c0_54, %c48_55] : memref<8x64xbf16, #tpu.memory_space<vmem>>, vector<8x16xbf16>
    tpu.vector_store %arg15[%c0_54, %c48_55], %108 {strides = array<i32>} : memref<8x64xbf16, #tpu.memory_space<vmem>>, vector<8x16xbf16>,
    %c0_56 = arith.constant 0 : index
    %c0_57 = arith.constant 0 : index
    %110 = vector.load %arg15[%c0_56, %c0_57] : memref<8x64xbf16, #tpu.memory_space<vmem>>, vector<8x64xbf16>
    %c0_58 = arith.constant 0 : index
    %c0_59 = arith.constant 0 : index
    %111 = vector.load %arg9[%c0_58, %c0_59] : memref<64x64xbf16, #tpu.memory_space<vmem>>, vector<64x64xbf16>
    %cst_60 = arith.constant dense<0.000000e+00> : vector<8x64xf32>
    %112 = tpu.matmul %110, %111, %cst_60 {dimension_numbers = #tpu.dot_dimension_numbers<[1], [0], [0], [1], [0, 0, 1, 1], [], []>} : vector<8x64xbf16>, vector<64x64xbf16>, vector<8x64xf32> -> vector<8x64xf32>
    %c0_61 = arith.constant 0 : index
    %c0_62 = arith.constant 0 : index
    %113 = vector.load %arg10[%c0_61, %c0_62] : memref<1x64xf32, #tpu.memory_space<vmem>>, vector<1x64xf32>
    %114 = vector.broadcast %113 : vector<1x64xf32> to vector<8x64xf32>
    %115 = arith.addf %112, %114 : vector<8x64xf32>
    %c0_63 = arith.constant 0 : index
    %c0_64 = arith.constant 0 : index
    %c0_65 = arith.constant 0 : index
    %116 = vector.load %arg11[%c0_63, %c0_64, %c0_65] : memref<1x8x64xf32, #tpu.memory_space<vmem>>, vector<1x8x64xf32>
    %117 = vector.shape_cast %116 : vector<1x8x64xf32> to vector<8x64xf32>
    %118 = vector.shape_cast %115 : vector<8x64xf32> to vector<1x8x64xf32>
    tpu.vector_store %arg11[%c0_63, %c0_64, %c0_65], %118 {strides = array<i32>} : memref<1x8x64xf32, #tpu.memory_space<vmem>>, vector<1x8x64xf32>,
    return
  }
  func.func @transform_0(%arg0: i32, %arg1: i32) -> (i32, i32, i32) {
    %c0_i32 = arith.constant 0 : i32
    %c0_i32_0 = arith.constant 0 : i32
    %c0_i32_1 = arith.constant 0 : i32
    return %arg0, %c0_i32, %c0_i32_0 : i32, i32, i32
  }
  func.func @transform_1(%arg0: i32, %arg1: i32) -> (i32, i32) {
    %c0_i32 = arith.constant 0 : i32
    %c0_i32_0 = arith.constant 0 : i32
    %c0_i32_1 = arith.constant 0 : i32
    return %c0_i32, %c0_i32_0 : i32, i32
  }
  func.func @transform_2(%arg0: i32, %arg1: i32) -> (i32, i32) {
    %c0_i32 = arith.constant 0 : i32
    %c0_i32_0 = arith.constant 0 : i32
    %c0_i32_1 = arith.constant 0 : i32
    return %c0_i32, %c0_i32_0 : i32, i32
  }
  func.func @transform_3(%arg0: i32, %arg1: i32) -> (i32, i32) {
    %c0_i32 = arith.constant 0 : i32
    %c0_i32_0 = arith.constant 0 : i32
    %c0_i32_1 = arith.constant 0 : i32
    return %c0_i32, %c0_i32_0 : i32, i32
  }
  func.func @transform_4(%arg0: i32, %arg1: i32) -> (i32, i32) {
    %c0_i32 = arith.constant 0 : i32
    %c0_i32_0 = arith.constant 0 : i32
    %c0_i32_1 = arith.constant 0 : i32
    return %c0_i32, %c0_i32_0 : i32, i32
  }
  func.func @transform_5(%arg0: i32, %arg1: i32) -> (i32, i32) {
    %c0_i32 = arith.constant 0 : i32
    %c0_i32_0 = arith.constant 0 : i32
    %c0_i32_1 = arith.constant 0 : i32
    return %c0_i32, %c0_i32_0 : i32, i32
  }
  func.func @transform_6(%arg0: i32, %arg1: i32) -> (i32, i32) {
    %c0_i32 = arith.constant 0 : i32
    %c0_i32_0 = arith.constant 0 : i32
    %c0_i32_1 = arith.constant 0 : i32
    return %c0_i32, %c0_i32_0 : i32, i32
  }
  func.func @transform_7(%arg0: i32, %arg1: i32) -> (i32, i32) {
    %c0_i32 = arith.constant 0 : i32
    %c0_i32_0 = arith.constant 0 : i32
    %c0_i32_1 = arith.constant 0 : i32
    return %c0_i32, %c0_i32_0 : i32, i32
  }
  func.func @transform_8(%arg0: i32, %arg1: i32) -> (i32, i32) {
    %c0_i32 = arith.constant 0 : i32
    %c0_i32_0 = arith.constant 0 : i32
    %c0_i32_1 = arith.constant 0 : i32
    return %c0_i32, %c0_i32_0 : i32, i32
  }
  func.func @transform_9(%arg0: i32, %arg1: i32) -> (i32, i32, i32) {
    %c0_i32 = arith.constant 0 : i32
    %c0_i32_0 = arith.constant 0 : i32
    return %arg0, %arg1, %c0_i32 : i32, i32, i32
  }
  func.func @transform_10(%arg0: i32, %arg1: i32) -> (i32, i32, i32, i32) {
    %c0_i32 = arith.constant 0 : i32
    %c0_i32_0 = arith.constant 0 : i32
    %c0_i32_1 = arith.constant 0 : i32
    return %arg0, %c0_i32, %arg1, %c0_i32_0 : i32, i32, i32, i32
  }
}

</mosaic_0001>

<bundles_post_ra>
// kernel: normal_attention.1
= control target key start
LH: loop header
LB: loop body
LE: loop exit
PB: predicated region body
PF: predicated region fallthrough
CT: control target
= control target key end

     0   :  { %s1837_s0 = inlined_call_operand.vmem [shape: bf16[2,16,64], index: 0, kind: input, shape index: {}]   ;;  %s1838_s1 = inlined_call_operand.vmem [shape: bf16[64,64], index: 1, kind: input, shape index: {}]   ;;  %s1839_s2 = inlined_call_operand.vmem [shape: f32[1,64], index: 2, kind: input, shape index: {}]   ;;  %s1840_s3 = inlined_call_operand.vmem [shape: bf16[64,64], index: 3, kind: input, shape index: {}]   ;;  %s1841_s4 = inlined_call_operand.vmem [shape: f32[1,64], index: 4, kind: input, shape index: {}]   ;;  %s1842_s5 = inlined_call_operand.vmem [shape: bf16[64,64], index: 5, kind: input, shape index: {}]   ;;  %s1843_s6 = inlined_call_operand.vmem [shape: f32[1,64], index: 6, kind: input, shape index: {}]   ;;  %s1844_s7 = inlined_call_operand.vmem [shape: bf16[64,64], index: 7, kind: input, shape index: {}]   ;;  %s1845_s8 = inlined_call_operand.vmem [shape: f32[1,64], index: 8, kind: input, shape index: {}]   ;;  %s1846_s9 = inlined_call_operand.hbm [shape: f32[2,16,64], index: 9, kind: output, shape index: {0}]   ;;  %s1847_s10 = inlined_call_operand.hbm [shape: bf16[2,4,16,16], index: 10, kind: output, shape index: {1}]  }
   0x1   :  { %1853 = sst [smem:[#allocation17_spill]] %s1837_s0 }
   0x2   :  { %1854 = sst [smem:[#allocation18_spill]] %s1838_s1 }
   0x3   :  { %1855 = sst [smem:[#allocation19_spill]] %s1839_s2 }
   0x4   :  { %1856 = sst [smem:[#allocation20_spill]] %s1840_s3 }
   0x5   :  { %1857 = sst [smem:[#allocation21_spill]] %s1841_s4 }
   0x6   :  { %16 = vsyncpa [#allocation6], 0 }
   0x7   :  { %18 = vsyncpa [#allocation6 + $0x1], 0 }
   0x8   :  { %19 = vsyncpa [#allocation8], 0 }
   0x9   :  { %21 = vsyncpa [#allocation8 + $0x1], 0  ;;  %s1581_s13 = smov 0   ;;  %s1583_s14 = smov 0  }
   0xa   :  { %s1585_s15 = smov 0   ;;  %s1587_s16 = smov 0  }
   0xb   :  { %s1589_s17 = smov 0   ;;  %s1591_s18 = smov 0  }
   0xc   :  { %s1593_s19 = smov 0   ;;  %s1595_s20 = smov 0  }
   0xd LB: > { %1858 = sst [smem:[#allocation11_spill]] %s1495_s15  ;;  %s1122_s21 = sadd.s32 4294967295, %s1515_s20   ;;  %s1515_s20 = sphi %s1595_s20, %s27_s20   ;;  %s1511_s19 = sphi %s1593_s19, %s1876_s19   ;;  %s1507_s18 = sphi %s1591_s18, %s1875_s18   ;;  %s1503_s17 = sphi %s1589_s17, %s1874_s17   ;;  %s1499_s16 = sphi %s1587_s16, %s1873_s16   ;;  %s1495_s15 = sphi %s1585_s15, %s1872_s15   ;;  %s1491_s14 = sphi %s1583_s14, %s1878_s14   ;;  %s1487_s13 = sphi %s1581_s13, %s1877_s13  }
   0xe   : > { %1859 = sst [smem:[#allocation12_spill]] %s1507_s18  ;;  %s1123_s22 = sadd.s32 4294967294, %s1515_s20  }
   0xf   : > { %1860 = sst [smem:[#allocation13_spill]] %s1511_s19  ;;  %s36_s23 = sadd.s32 1, %s1507_s18 }
  0x10   : > { %p37_p0 = scmp.ge.s32.totalorder %s36_s23, 2  ;;  %s39_s24 = sadd.s32 1, %s1511_s19 }
  0x11   : > { %p252_p1 = scmp.ne.s32.totalorder %s1495_s15, %s1491_s14  ;;  %p253_p2 = scmp.eq.s32.totalorder %s1122_s21, 3 }
  0x12   : > { %s1880_s23 = smov (%p37_p0, %s36_s23), 0  ;;  %s1882_s24 = smov (!%p37_p0, %s39_s24), %s1511_s19 }
  0x13   : > { %1861 = sst [smem:[#allocation14_spill]] %s1880_s23  ;;  %s238_s25 = ssub.s32 %s1507_s18, %s1880_s23 }
  0x14   : > { %p1632_p3 = por %p253_p2, %p252_p1  ;;  %p41_p4 = scmp.ge.s32.totalorder %s1882_s24, 2 }
  0x15   : > { %p258_p5 = scmp.ne.s32.totalorder %s1491_s14, %s1487_s13  ;;  %p259_p6 = scmp.eq.s32.totalorder %s1123_s22, 3 }
  0x16   : > { %p1126_p7 = scmp.ge.s32.totalorder %s1515_s20, 1  ;;  %s1884_s24 = smov (%p41_p4, %s1882_s24), 0 }
  0x17   : > { %1863 = sst [smem:[#allocation15_spill]] %s1884_s24  ;;  %p1641_p8 = por %p259_p6, %p258_p5 }
  0x18   : > { %p337_p9 = scmp.lt.s32.totalorder %s1515_s20, 5  ;;  %s237_s28 = ssub.s32 %s1511_s19, %s1884_s24 }
  0x19   : > { %s242_s29 = sadd.s32 1, %s1495_s15  ;;  %s239_s30 = sor.u32 %s238_s25, %s237_s28 }
  0x1a   : > { %p338_p10 = pnand %p1126_p7, %p337_p9  ;;  %p240_p11 = scmp.eq.s32.totalorder %s239_s30, 0 }
  0x1b   : > { %s1653_s12 = sand.u32 (!%p338_p10), 1, %s1491_s14   ;;  %p380_p12 = scmp.lt.s32.totalorder (!%p338_p10), %s1503_s17, 1 }
  0x1c   : > { %s1650_s11 = scalar_select %p240_p11, %s1495_s15, %s242_s29  }
  0x1d   : > { %341 = sbr.rel (%p338_p10) target bundleno = 1761 (0x6e1), region = 56  ;;  %s1127_s21 = sshll.u32 (!%p338_p10), %s1653_s12, 3 }
  0x1e   : > { %1865 = sst [smem:[#allocation16_spill]] %s1650_s11  ;;  %s1128_s22 = sshll.u32 (!%p338_p10), %s1653_s12, 4 }
  0x1f   : > { %s1866_s0 = sld [smem:[#allocation17_spill]] (!%p338_p10)  ;;  %s1664_s28 = scalar_lea.vmem (!%p338_p10), [#allocation5], %s1127_s21 }
  0x20   : > { %s1666_s29 = scalar_lea.vmem (!%p338_p10), [#allocation7], %s1128_s22  ;;  %p1131_p13 = scmp.ne.s32.totalorder (!%p338_p10), %s1499_s16, 0 }
  0x22   : > { %s381_s23 = scalar_select %p380_p12, %s1503_s17, 1 }
  0x23   : > { %389 = sbr.rel (%p1131_p13) target bundleno = 409 (0x199), region = 60  ;;  %s1867_s3 = sld [smem:[#allocation20_spill]] (!%p1131_p13) }
  0x24   : > { %s1257_s18 = sshll.u32 %s381_s23, 3  ;;  %s1868_s4 = sld [smem:[#allocation21_spill]] (!%p1131_p13) }
  0x25   : > { %s1662_s25 = scalar_lea.vmem %s1866_s0, %s1257_s18 }
  0x28   : > { %v1258_v4 = vld [vmem:[%s1662_s25] sm:$0xff]  ;;  %vm433_vm0 = vcmask 523264   ;;  %v1266_v5 = vld [vmem:[%s1842_s5 + $0x18] sm:$0xff]  ;;  %v1265_v6 = vld [vmem:[%s1842_s5 + $0x10] sm:$0xff]  ;;  %vm541_vm1 = vcmask 125952   ;;  %vm552_vm2 = vcmask 519168  }
  0x29   : > { %v1262_v0 = vld [vmem:[%s1867_s3 + $0x18] sm:$0xff]  ;;  %v1261_v1 = vld [vmem:[%s1867_s3 + $0x10] sm:$0xff]  ;;  %v1260_v2 = vld [vmem:[%s1867_s3 + $0x8] sm:$0xff]  ;;  %491 = vmatpush.bf16.msra.mxu1 %v1266_v5 }
  0x2a   : > { %441 = vmatpush.bf16.msra.mxu0 %v1262_v0  ;;  %v1259_v3 = vld [vmem:[%s1867_s3] sm:$0xff]  ;;  %v1264_v7 = vld [vmem:[%s1842_s5 + $0x8] sm:$0xff] }
  0x2b   : > { %v1263_v8 = vld [vmem:[%s1842_s5] sm:$0xff] }
  0x2c   : > { %v1369_v9 = vld [vmem:[%s1868_s4] ss:$0 sm:$0xff] }
  0x2d   : > { %492 = vmatpush.bf16.msra.mxu1 %v1265_v6  ;;  %v1370_v16 = vld [vmem:[%s1843_s6] ss:$0 sm:$0xff] }
  0x2e   : > { %442 = vmatpush.bf16.msra.mxu0 %v1261_v1 }
  0x31   : > { %493 = vmatpush.bf16.msra.mxu1 %v1264_v7 }
  0x32   : > { %443 = vmatpush.bf16.msra.mxu0 %v1260_v2 }
  0x35   : > { %494 = vmatpush.bf16.msra.mxu1 %v1263_v8 }
  0x36   : > { %444 = vmatpush.bf16.msra.mxu0 %v1259_v3 }
  0x38   : > { %1169 = vmatmul.msk.bf16.vlgmr.msra.gmra.mxu1 %vm433_vm0, %v1258_v4 }
  0x39   : > { %1152 = vmatmul.msk.bf16.vlgmr.msra.gmra.mxu0 %vm433_vm0, %v1258_v4 }
  0xb5   : > { %v496_v17 = vpop.f32.mrf.mxu1 }
  0xb6   : > { %v446_v10 = vpop.f32.mrf.mxu0  ;;  %v497_v18 = vadd.f32 %v1370_v16, %v496_v17 }
  0xb7   : > { %v447_v11 = vadd.f32 %v1369_v9, %v446_v10 }
  0xb8   : > { %v550_v19 = vpack.c.bf16 %v497_v18, %v497_v18 }
  0xb9   : > { %501 = vxpose.xlu0.b32.start [1/2] (short) (narrow) %v447_v11, 64 }
  0xba   : > { %553 = vst.msk [vmem:[#allocation3] sm:$0xf] %vm552_vm2, %v550_v19 }
  0xbd   : > { %v498_v22 = vpop.f32.mrf.mxu1 }
  0xbe   : > { %v448_v12 = vpop.f32.mrf.mxu0  ;;  %v499_v23 = vadd.f32 %v1370_v16, %v498_v22 }
  0xbf   : > { %v449_v13 = vadd.f32 %v1369_v9, %v448_v12 }
  0xc0   : > { %v551_v24 = vpack.c.bf16 %v499_v23, %v499_v23 }
  0xc1   : > { %502 = vxpose.xlu0.b32.end [2/2] (short) (narrow) %v449_v13, 64 }
  0xc2   : > { %554 = vst.msk [vmem:[#allocation3 + $0x4] sm:$0xf] %vm552_vm2, %v551_v24 }
 0x15d   : > { %v517_v14 = vpop.trf.xlu0 }
 0x15e   : > { %v533_v15 = vpack.c.bf16 %v517_v14, %v517_v14 }
 0x160   : > { %542 = vst.msk [vmem:[#allocation2] sm:$0xf] %vm541_vm1, %v533_v15 }
 0x165   : > { %v518_v20 = vpop.trf.xlu0 }
 0x166   : > { %v534_v21 = vpack.c.bf16 %v518_v20, %v518_v20 }
 0x168   : > { %543 = vst.msk [vmem:[#allocation2 + $0x4] sm:$0xf] %vm541_vm1, %v534_v21 }
 0x16d   : > { %v519_v25 = vpop.trf.xlu0 }
 0x16e   : > { %v535_v26 = vpack.c.bf16 %v519_v25, %v519_v25 }
 0x170   : > { %544 = vst.msk [vmem:[#allocation2 + $0x8] sm:$0xf] %vm541_vm1, %v535_v26 }
 0x175   : > { %v520_v27 = vpop.trf.xlu0 }
 0x176   : > { %v536_v28 = vpack.c.bf16 %v520_v27, %v520_v27 }
 0x178   : > { %545 = vst.msk [vmem:[#allocation2 + $0xc] sm:$0xf] %vm541_vm1, %v536_v28 }
 0x17d   : > { %v521_v29 = vpop.trf.xlu0 }
 0x17e   : > { %v537_v30 = vpack.c.bf16 %v521_v29, %v521_v29 }
 0x180   : > { %546 = vst.msk [vmem:[#allocation2 + $0x10] sm:$0xf] %vm541_vm1, %v537_v30 }
 0x185   : > { %v522_v31 = vpop.trf.xlu0 }
 0x186   : > { %v538_v32 = vpack.c.bf16 %v522_v31, %v522_v31 }
 0x188   : > { %547 = vst.msk [vmem:[#allocation2 + $0x14] sm:$0xf] %vm541_vm1, %v538_v32 }
 0x18d   : > { %v523_v33 = vpop.trf.xlu0 }
 0x18e   : > { %v539_v34 = vpack.c.bf16 %v523_v33, %v523_v33 }
 0x190   : > { %548 = vst.msk [vmem:[#allocation2 + $0x18] sm:$0xf] %vm541_vm1, %v539_v34 }
 0x195   : > { %v524_v35 = vpop.trf.xlu0 }
 0x196   : > { %v540_v36 = vpack.c.bf16 %v524_v35, %v524_v35 }
 0x198   : > { %549 = vst.msk [vmem:[#allocation2 + $0x1c] sm:$0xf] %vm541_vm1, %v540_v36 }
 0x199 PF: > { %s1869_s1 = sld [smem:[#allocation18_spill]]  ;;  %s1170_s24 = sshll.u32 %s1499_s16, 3  ;;  %vm597_vm3 = vcmask 523264   ;;  %v1271_v42 = vld [vmem:[#allocation2] sm:$0xff]  ;;  %vm625_vm4 = vcmask 130048   ;;  %v1273_v51 = vld [vmem:[#allocation2 + $0x8] sm:$0xff] }
 0x19a   : > { %s556_s21 = sshra.s32 %s1170_s24, 3  ;;  %636 = vmatpush.bf16.msra.mxu1 %v1271_v42  ;;  %s1870_s2 = sld [smem:[#allocation19_spill]]  ;;  %709 = vmatpush.bf16.msra.mxu3 %v1273_v51  ;;  %v1272_v8 = vld [vmem:[#allocation3] sm:$0xff]  ;;  %v1275_v9 = vld [vmem:[#allocation2 + $0x10] sm:$0xff]  ;;  %vm658_vm5 = vcmask 125952   ;;  %vm762_vm6 = vcmask 257152  }
 0x19b   : > { %s1171_s15 = sshll.u32 %s556_s21, 2  ;;  %s1517_s0 = smov 80   ;;  %676 = vmatpush.bf16.msra.mxu2 %v1272_v8  ;;  %v1274_v30 = vld [vmem:[#allocation3] sm:$0xff]  ;;  %vm839_vm7 = vcmask 388352   ;;  %vm916_vm8 = vcmask 519552  }
 0x19c   : > { %s559_s30 = scalar_lea.vmem %s1662_s25, %s1171_s15  ;;  %s1518_s3 = smov 112   ;;  %v1278_v33 = vld [vmem:[#allocation3] sm:$0xff] }
 0x19d   : > { %v560_v41 = vld [vmem:[%s559_s30] sm:$0xf]  ;;  %s1519_s25 = smov 96   ;;  %s1520_s19 = smov 16  }
 0x19e   : > { %s1521_s24 = smov 48   ;;  %s1522_s30 = smov 32  }
 0x19f   : > { %v1270_v37 = vld [vmem:[%s1869_s1 + $0x18] sm:$0xff]  ;;  %v1269_v38 = vld [vmem:[%s1869_s1 + $0x10] sm:$0xff]  ;;  %v1268_v39 = vld [vmem:[%s1869_s1 + $0x8] sm:$0xff]  ;;  %786 = vmatpush.bf16.msrb.mxu2 %v1275_v9  ;;  %s1007_s15 = sshll.u32 %s1666_s29, 4  ;;  %s978_s23 = scalar_lea.sflag [#allocation8], %s1653_s12  ;;  %s1008_s15 = int_to_ptr.vmem [resolvable:$true] %s1007_s15 }
 0x1a0   : > { %605 = vmatpush.bf16.msra.mxu0 %v1270_v37  ;;  %v1267_v40 = vld [vmem:[%s1869_s1] sm:$0xff]  ;;  %v1277_v43 = vld [vmem:[#allocation2 + $0x18] sm:$0xff] }
 0x1a1   : > { %v1371_v44 = vld [vmem:[%s1870_s2] ss:$0 sm:$0xff]  ;;  %v1282_v9 = vld [vmem:[%s1844_s7 + $0x18] sm:$0xff] }
 0x1a4   : > { %606 = vmatpush.bf16.msra.mxu0 %v1269_v38 }
 0x1a8   : > { %607 = vmatpush.bf16.msra.mxu0 %v1268_v39 }
 0x1ac   : > { %608 = vmatpush.bf16.msra.mxu0 %v1267_v40 }
 0x1af   : > { %1188 = vmatmul.msk.bf16.vlgmr.msra.gmra.mxu0 %vm597_vm3, %v560_v41 }
 0x1b0   : > { %863 = vmatpush.bf16.msrb.mxu0 %v1277_v43 }
 0x22c   : > { %v610_v45 = vpop.f32.mrf.mxu0 }
 0x22d   : > { %v611_v46 = vadd.f32 %v1371_v44, %v610_v45 }
 0x22f   : > { %v614_v47 = vpack.c.bf16 %v611_v46, %v611_v46 }
 0x231   : > { %v689_v48 = vunpack.c.l.b16 %v614_v47  ;;  %1193 = vmatmul.msk.bf16.vlgmr.msra.gmra.mxu1 %vm625_vm4, %v614_v47 }
 0x233   : > { %v690_v49 = vpack.c.b16 %v689_v48, %v689_v48 }
 0x234   : > { %v612_v50 = vpop.f32.mrf.mxu0 }
 0x235   : > { %845 = vrot.lane.b32.xlu2 %v690_v49, %s1517_s0  ;;  %691 = vrot.lane.b32.xlu1 %v690_v49, %s1518_s3 }
 0x23d   : > { %768 = vrot.lane.b32.xlu1 %v690_v49, %s1519_s25 }
 0x28f   : > { %v846_v52 = vpop.permute.xlu2 %845 }
 0x290   : > { %1225 = vmatmul.msk.bf16.vlgmr.msrb.gmra.mxu0 %vm625_vm4, %v846_v52 }
 0x2a7   : > { %v692_v53 = vpop.permute.xlu1 %691 }
 0x2a8   : > { %1203 = vmatmul.msk.bf16.vlgmr.msra.gmra.mxu3 %vm625_vm4, %v692_v53 }
 0x2ae   : > { %v638_v54 = vpop.f32.mrf.mxu1 }
 0x2af   : > { %v642_v55 = vsel %vm625_vm4, %v638_v54, -inf  ;;  %v769_v14 = vpop.permute.xlu1 %768 }
 0x2b0   : > { %643 = vmax.xlane.f32.xlu0 %v642_v55  ;;  %v1276_v55 = vld [vmem:[#allocation3] sm:$0xff] }
 0x2b6   : > { %v640_v56 = vpop.f32.mrf.mxu1 }
 0x30d   : > { %v865_v57 = vpop.f32.mrf.mxu0 }
 0x30e   : > { %v869_v58 = vsel %vm625_vm4, %v865_v57, -inf }
 0x30f   : > { %870 = vmax.xlane.f32.xlu1 %v869_v58 }
 0x315   : > { %v867_v59 = vpop.f32.mrf.mxu0 }
 0x323   : > { %v644_v60 = vpop.xlane.xlu0 %643 }
 0x324   : > { %v645_v61 = vsub.f32 %v638_v54, %v644_v60 }
 0x326   : > { %v646_v62 = vpack.c.bf16 %v645_v61, %v645_v61 }
 0x328   : > { %v647_v63 = vunpack.c.l.bf16 %v646_v62  ;;  %892 = vrot.lane.b32.xlu1 %v1278_v33, %s1517_s0 }
 0x32a   : > { %v648_v0 = vmul.f32 1.442695, %v647_v63 }
 0x32b   : > { %v711_v1 = vpop.f32.mrf.mxu3 }
 0x32c   : > { %1373 = vpow2.f32 %v648_v0  ;;  %v715_v2 = vsel %vm625_vm4, %v711_v1, -inf }
 0x32d   : > { %716 = vmax.xlane.f32.xlu2 %v715_v2 }
 0x332   : > { %v1374_v3 = vpop.eup %1373 }
 0x333   : > { %v713_v4 = vpop.f32.mrf.mxu3  ;;  %v650_v5 = vpack.c.bf16 %v1374_v3, %v1374_v3 }
 0x335   : > { %v651_v6 = vunpack.c.l.bf16 %v650_v5 }
 0x337   : > { %v652_v7 = vsel %vm625_vm4, %v651_v6, 0.0 }
 0x338   : > { %653 = vadd.xlane.f32.xlu0 %v652_v7 }
 0x382   : > { %v871_v31 = vpop.xlane.xlu1 %870 }
 0x383   : > { %v872_v32 = vsub.f32 %v865_v57, %v871_v31 }
 0x385   : > { %v873_v34 = vpack.c.bf16 %v872_v32, %v872_v32 }
 0x387   : > { %v874_v35 = vunpack.c.l.bf16 %v873_v34 }
 0x389   : > { %v875_v36 = vmul.f32 1.442695, %v874_v35 }
 0x39a   : > { %v893_v56 = vpop.permute.xlu1 %892 }
 0x3a0   : > { %v717_v15 = vpop.xlane.xlu2 %716 }
 0x3a1   : > { %v718_v16 = vsub.f32 %v711_v1, %v717_v15  ;;  %v1279_v15 = vld [vmem:[%s1844_s7] sm:$0xff] }
 0x3a3   : > { %v719_v17 = vpack.c.bf16 %v718_v16, %v718_v16 }
 0x3a5   : > { %v720_v18 = vunpack.c.l.bf16 %v719_v17 }
 0x3a7   : > { %v721_v21 = vmul.f32 1.442695, %v720_v18 }
 0x3ab   : > { %v654_v10 = vpop.xlane.xlu0 %653 }
 0x3ac   : > { %1375 = vrcp.f32 %v654_v10  ;;  %v1281_v10 = vld [vmem:[%s1844_s7 + $0x10] sm:$0xff] }
 0x3ad   : > { %1377 = vpow2.f32 %v721_v21 }
 0x3ae   : > { %1379 = vpow2.f32 %v875_v36 }
 0x3b2   : > { %v1376_v11 = vpop.eup %1375 }
 0x3b3   : > { %v656_v12 = vmul.f32 %v1376_v11, %v651_v6  ;;  %v1378_v23 = vpop.eup %1377 }
 0x3b4   : > { %v723_v26 = vpack.c.bf16 %v1378_v23, %v1378_v23  ;;  %v1380_v37 = vpop.eup %1379 }
 0x3b5   : > { %v657_v13 = vpack.c.bf16 %v656_v12, %v656_v12  ;;  %v877_v38 = vpack.c.bf16 %v1380_v37, %v1380_v37 }
 0x3b6   : > { %v724_v27 = vunpack.c.l.bf16 %v723_v26 }
 0x3b7   : > { %659 = vst.msk [vmem:[%s1666_s29] sm:$0xf] %vm658_vm5, %v657_v13  ;;  %1198 = vmatmul.msk.bf16.vlgmr.msra.gmra.mxu2 %vm625_vm4, %v657_v13  ;;  %v878_v39 = vunpack.c.l.bf16 %v877_v38 }
 0x3b8   : > { %v725_v29 = vsel %vm625_vm4, %v724_v27, 0.0  ;;  %962 = vmatpush.bf16.msra.mxu2 %v1282_v9 }
 0x3b9   : > { %v879_v40 = vsel %vm625_vm4, %v878_v39, 0.0 }
 0x3bc   : > { %963 = vmatpush.bf16.msra.mxu2 %v1281_v10 }
 0x3c7   : > { %1214 = vmatmul.msk.bf16.vlgmr.msrb.gmra.mxu2 %vm625_vm4, %v769_v14  ;;  %v1280_v14 = vld [vmem:[%s1844_s7 + $0x8] sm:$0xff] }
 0x3c8   : > { %964 = vmatpush.bf16.msra.mxu2 %v1280_v14 }
 0x3cc   : > { %965 = vmatpush.bf16.msra.mxu2 %v1279_v15 }
 0x43a   : > { %v678_v19 = vpop.f32.mrf.mxu2 }
 0x43b   : > { %v682_v20 = vpack.c.bf16 %v678_v19, %v678_v19 }
 0x43d   : > { %683 = vst.msk [vmem:[#allocation4] sm:$0xf] %vm658_vm5, %v682_v20 }
 0x442   : > { %v680_v22 = vpop.f32.mrf.mxu2 }
 0x44a   : > { %v788_v24 = vpop.f32.mrf.mxu2 }
 0x44b   : > { %v792_v25 = vsel %vm625_vm4, %v788_v24, -inf }
 0x44c   : > { %793 = vmax.xlane.f32.xlu0 %v792_v25 }
 0x452   : > { %v790_v28 = vpop.f32.mrf.mxu2 }
 0x454   : > { %726 = vadd.xlane.f32.xlu0 %v725_v29 }
 0x468   : > { %738 = vrot.lane.b32.xlu0 %v1274_v30, %s1518_s3 }
 0x492   : > { %880 = vadd.xlane.f32.xlu0 %v879_v40 }
 0x4bf   : > { %v794_v41 = vpop.xlane.xlu0 %793 }
 0x4c0   : > { %v795_v42 = vsub.f32 %v788_v24, %v794_v41 }
 0x4c2   : > { %v796_v43 = vpack.c.bf16 %v795_v42, %v795_v42 }
 0x4c4   : > { %v797_v44 = vunpack.c.l.bf16 %v796_v43 }
 0x4c6   : > { %v798_v45 = vmul.f32 1.442695, %v797_v44 }
 0x4c7   : > { %v727_v46 = vpop.xlane.xlu0 %726 }
 0x4c8   : > { %1381 = vpow2.f32 %v798_v45 }
 0x4c9   : > { %1383 = vrcp.f32 %v727_v46 }
 0x4ce   : > { %v1382_v47 = vpop.eup %1381 }
 0x4cf   : > { %v1384_v48 = vpop.eup %1383  ;;  %v800_v49 = vpack.c.bf16 %v1382_v47, %v1382_v47 }
 0x4d0   : > { %v729_v50 = vmul.f32 %v1384_v48, %v724_v27 }
 0x4d1   : > { %v801_v51 = vunpack.c.l.bf16 %v800_v49 }
 0x4d2   : > { %v730_v52 = vpack.c.bf16 %v729_v50, %v729_v50 }
 0x4d3   : > { %v802_v53 = vsel %vm625_vm4, %v801_v51, 0.0 }
 0x4d4   : > { %803 = vadd.xlane.f32.xlu2 %v802_v53  ;;  %1204 = vst.msk [vmem:[%s1666_s29 + $0x4] sm:$0xf] %vm658_vm5, %v730_v52 }
 0x4da   : > { %v739_v54 = vpop.permute.xlu0 %738 }
 0x4db   : > { %751 = vmatpush.bf16.msrb.mxu1 %v739_v54 }
 0x4de   : > { %1209 = vmatmul.msk.bf16.vlgmr.msrb.gmra.mxu1 %vm625_vm4, %v730_v52 }
 0x4df   : > { %905 = vmatpush.bf16.msra.mxu1 %v893_v56 }
 0x4ec   : > { %815 = vrot.lane.b32.xlu2 %v1276_v55, %s1519_s25  ;;  %s1253_s25 = sshll.u32 %s1503_s17, 3 }
 0x505   : > { %v881_v57 = vpop.xlane.xlu0 %880 }
 0x506   : > { %1385 = vrcp.f32 %v881_v57 }
 0x50c   : > { %v1386_v58 = vpop.eup %1385 }
 0x50d   : > { %v883_v59 = vmul.f32 %v1386_v58, %v878_v39 }
 0x50f   : > { %v884_v60 = vpack.c.bf16 %v883_v59, %v883_v59 }
 0x511   : > { %1226 = vst.msk [vmem:[%s1666_s29 + $0xc] sm:$0xf] %vm658_vm5, %v884_v60  ;;  %1231 = vmatmul.msk.bf16.vlgmr.msra.gmra.mxu1 %vm625_vm4, %v884_v60 }
 0x547   : > { %v804_v61 = vpop.xlane.xlu2 %803 }
 0x548   : > { %1387 = vrcp.f32 %v804_v61 }
 0x54e   : > { %v1388_v62 = vpop.eup %1387 }
 0x54f   : > { %v806_v63 = vmul.f32 %v1388_v62, %v801_v51  ;;  %v816_v0 = vpop.permute.xlu2 %815 }
 0x550   : > { %828 = vmatpush.bf16.msrb.mxu3 %v816_v0 }
 0x551   : > { %v807_v1 = vpack.c.bf16 %v806_v63, %v806_v63 }
 0x553   : > { %1215 = vst.msk [vmem:[%s1666_s29 + $0x8] sm:$0xf] %vm658_vm5, %v807_v1  ;;  %1220 = vmatmul.msk.bf16.vlgmr.msrb.gmra.mxu3 %vm625_vm4, %v807_v1 }
 0x55b   : > { %v753_v2 = vpop.f32.mrf.mxu1 }
 0x55c   : > { %v757_v3 = vpack.c.bf16 %v753_v2, %v753_v2 }
 0x55e   : > { %759 = vrot.lane.b32.xlu2 %v757_v3, %s1520_s19  ;;  %s1004_s19 = sadd.s32 %s1499_s16, %s1253_s25  ;;  %s1409_s25 = scalar_lea.hbm %s1847_s10, 64 }
 0x563   : > { %v755_v4 = vpop.f32.mrf.mxu1 }
 0x58e   : > { %v907_v5 = vpop.f32.mrf.mxu1 }
 0x58f   : > { %v911_v6 = vpack.c.bf16 %v907_v5, %v907_v5 }
 0x591   : > { %913 = vrot.lane.b32.xlu2 %v911_v6, %s1521_s24  ;;  %s1254_s24 = sshll.u32 %s1004_s19, 2 }
 0x592   : > { %s1006_s22 = scalar_lea.hbm %s1847_s10, %s1254_s24 }
 0x596   : > { %v909_v7 = vpop.f32.mrf.mxu1 }
 0x5b8   : > { %v760_v8 = vpop.permute.xlu2 %759 }
 0x5b9   : > { %763 = vst.msk [vmem:[#allocation4] sm:$0xf] %vm762_vm6, %v760_v8 }
 0x5d6   : > { %v830_v11 = vpop.f32.mrf.mxu3 }
 0x5d7   : > { %v834_v12 = vpack.c.bf16 %v830_v11, %v830_v11 }
 0x5d9   : > { %836 = vrot.lane.b32.xlu1 %v834_v12, %s1522_s30  ;;  %s1009_s30 = sshll.u32 %s1006_s22, 4  ;;  %s1010_s30 = int_to_ptr.hbm [resolvable:$true] %s1009_s30 }
 0x5da   : > { %s1403_s18 = sshra.s32 %s1010_s30, 4  ;;  %s1404_s18 = int_to_ptr.hbm [resolvable:$true] %s1403_s18 }
 0x5db   : > { %s1405_s0 = scalar_lea.hbm %s1404_s18, 16  ;;  %p1410_p4 = scmp.lt.s32.totalorder %s1404_s18, %s1847_s10 }
 0x5dc   : > { %p1406_p0 = scmp.ne.s32.totalorder %s1404_s18, %s1405_s0  ;;  %p1411_p5 = scmp.lt.s32.totalorder %s1409_s25, %s1405_s0 }
 0x5de   : > { %v832_v13 = vpop.f32.mrf.mxu3  ;;  %p1407_p1 = pnand %p1406_p0, %p1632_p3  ;;  %p1412_p6 = por %p1411_p5, %p1410_p4 }
 0x5e0   : > { %p1408_p2 = pneg %p1407_p1 }
 0x5e2   : > { %p1413_p7 = pnand %p1412_p6, %p1408_p2 }
 0x5eb   : > { %v914_v17 = vpop.permute.xlu2 %913 }
 0x64b   : > { %v837_v16 = vpop.permute.xlu1 %836 }
 0x64c   : > { %840 = vst.msk [vmem:[#allocation4] sm:$0xf] %vm839_vm7, %v837_v16 }
 0x64d   : > { %917 = vst.msk [vmem:[#allocation4] sm:$0xf] %vm916_vm8, %v914_v17 }
 0x654   : > { %v918_v18 = vld [vmem:[#allocation4] sm:$0xf] }
 0x655   : > { %1248 = vmatmul.msk.bf16.vlgmr.msra.gmra.mxu2 %vm597_vm3, %v918_v18 }
 0x656   : > { %1416 = shalt.err (!%p1413_p7)
}
 0x657   : > { %s1523_s29 = smov 64   ;;  %s1524_s24 = smov 128   ;;  %v1372_v19 = vld [vmem:[%s1845_s8] ss:$0 sm:$0xff] }
 0x658   : > { %s1525_s21 = smov 4   ;;  %s1251_s1 = sshll.u32 %s1503_s17, 1 }
 0x659   : > { %1284 = dma.vmem_to_hbm [thread:$0]  (%p1632_p3), %s1008_s15, 256, %s1010_s30, %s978_s23, %s1523_s29, %s1524_s24, %s1525_s21  }
 0x65a   : > { %s988_s11 = sadd.s32 %s1499_s16, %s1251_s1  ;;  %s992_s19 = sshll.u32 %s1664_s28, 4  ;;  %s993_s19 = int_to_ptr.vmem [resolvable:$true] %s992_s19 }
 0x65b   : > { %s1252_s2 = sshll.u32 %s988_s11, 3  ;;  %s973_s17 = scalar_lea.sflag [#allocation6], %s1653_s12 }
 0x65c   : > { %s990_s0 = scalar_lea.hbm %s1846_s9, %s1252_s2  ;;  %s1437_s29 = scalar_lea.hbm %s1846_s9, 32 }
 0x65d   : > { %s994_s4 = sshll.u32 %s990_s0, 4  ;;  %s995_s4 = int_to_ptr.hbm [resolvable:$true] %s994_s4 }
 0x65e   : > { %s1431_s16 = sshra.s32 %s995_s4, 4  ;;  %s1432_s16 = int_to_ptr.hbm [resolvable:$true] %s1431_s16 }
 0x65f   : > { %s1433_s15 = scalar_lea.hbm %s1432_s16, 8  ;;  %p1438_p12 = scmp.lt.s32.totalorder %s1432_s16, %s1846_s9 }
 0x660   : > { %p1434_p9 = scmp.ne.s32.totalorder %s1432_s16, %s1433_s15  ;;  %p1439_p13 = scmp.lt.s32.totalorder %s1437_s29, %s1433_s15 }
 0x662   : > { %p1435_p10 = pnand %p1434_p9, %p1632_p3  ;;  %p1440_p0 = por %p1439_p13, %p1438_p12 }
 0x664   : > { %p1436_p11 = pneg %p1435_p10 }
 0x666   : > { %p1441_p1 = pnand %p1440_p0, %p1436_p11 }
 0x6d8   : > { %v967_v20 = vpop.f32.mrf.mxu2 }
 0x6d9   : > { %v968_v21 = vadd.f32 %v1372_v19, %v967_v20 }
 0x6db   : > { %971 = vst.msk [vmem:[%s1664_s28] sm:$0xff] %vm597_vm3, %v968_v21 }
 0x6dc   : > { %1444 = shalt.err (!%p1441_p1)
}
 0x6dd   : > { %1283 = dma.vmem_to_hbm [thread:$0]  (%p1632_p3), %s993_s19, 128, %s995_s4, %s973_s17  }
 0x6e0   : > { %v969_v22 = vpop.f32.mrf.mxu2 }
 0x6e1 PF: > { %p1294_p2 = scmp.ge.s32.totalorder %s1515_s20, 2  ;;  %s1024_s12 = sand.u32 1, %s1487_s13  }
 0x6e2   : > { %s1025_s28 = scalar_lea.sflag [#allocation6], %s1024_s12 }
 0x6e3   : > { %p1288_p4 = pnand %p1294_p2, %p1641_p8 }
 0x6e5   : > { %p1289_p5 = pneg %p1288_p4 }
 0x6e7   : > { %1478 = dma.done.wait (%p1289_p5), %s1025_s28, 128  }
 0x6e8   : > { %1480 = vsyncadd (%p1289_p5), %s1025_s28, 4294967168  ;;  %s1035_s1 = scalar_lea.sflag [#allocation8], %s1024_s12 }
 0x6e9   : > { %1482 = dma.done.wait (%p1289_p5), %s1035_s1, 256  }
 0x6ea   : > { %1484 = vsyncadd (%p1289_p5), %s1035_s1, 4294967040  ;;  %s27_s20 = sadd.s32 1, %s1515_s20   ;;  %s1871_s4 = sld [smem:[#allocation11_spill]] }
 0x6eb   : > { %p24_p6 = scmp.ge.s32.totalorder %s27_s20, 6   ;;  %s1872_s15 = sld [smem:[#allocation16_spill]] }
 0x6ec   : > { %s1873_s16 = sld [smem:[#allocation12_spill]]  ;;  %s1877_s13 = smov %s1491_s14 }
 0x6ed   : > { %s1874_s17 = sld [smem:[#allocation13_spill]]  ;;  %26 = sbr.rel (!%p24_p6) target bundleno = 13 (0xd), region = 116 }
 0x6ee   : > { %s1875_s18 = sld [smem:[#allocation14_spill]] }
 0x6ef   : > { %s1876_s19 = sld [smem:[#allocation15_spill]] }
 0x6f0   : > { %s1878_s14 = smov %s1871_s4 }
 0x6f2   :  { %1041 = vsyncpa [#allocation6], 1 }
 0x6f3   :  { %1043 = vsyncpa [#allocation6 + $0x1], 1 }
 0x6f4   :  { %1044 = vsyncpa [#allocation8], 1 }
 0x6f5   :  { %1046 = vsyncpa [#allocation8 + $0x1], 1 }

</bundles_post_ra>
